<compile_context>
chip_gen: v6e
topology: v6e:2x2x1
jax: 0.10.0
libtpu: 0.0.40
codegen_flags: <defaults>
</compile_context>

<pallas_src>
import functools
import math

import jax
import jax.numpy as jnp
from jax import lax
from jax.experimental import pallas as pl
from jax.experimental.pallas import tpu as pltpu


def _mha_kernel(valid_lens_ref,              # SMEM, (bs,) int32  (scalar prefetch)
                q_ref, k_ref, v_ref,         # VMEM, (Bt, seq, in) float32
                wq_ref, wk_ref, wv_ref,      # VMEM, (heads, in, head_dim) bf16
                wo_ref,                      # VMEM, (heads, head_dim, H) bf16
                out_ref,                     # VMEM, (Bt, seq, H) float32
                *, num_heads: int, head_dim: int, batch_tile: int):
    bt = batch_tile
    seq = q_ref.shape[1]
    H = out_ref.shape[2]
    scale = 1.0 / math.sqrt(head_dim)
    b0 = pl.program_id(0) * bt               # first batch element of this tile

    # Flatten the batch tile so every projection matmul has M = Bt*seq rows.
    xq = q_ref[...].reshape(bt * seq, -1).astype(jnp.bfloat16)
    xk = k_ref[...].reshape(bt * seq, -1).astype(jnp.bfloat16)
    xv = v_ref[...].reshape(bt * seq, -1).astype(jnp.bfloat16)

    # Key-position mask shared by all heads: True where the key is valid.
    col = lax.broadcasted_iota(jnp.int32, (bt, seq, seq), 2)
    bidx = lax.broadcasted_iota(jnp.int32, (bt, seq, seq), 0)
    vl = jnp.zeros((bt, seq, seq), jnp.int32)
    for i in range(bt):                       # Bt cheap scalar reads from SMEM
        vl = jnp.where(bidx == i, valid_lens_ref[b0 + i], vl)
    valid = col < vl                          # (Bt, seq, seq) bool

    acc = jnp.zeros((bt * seq, H), jnp.float32)
    for h in range(num_heads):                # static unroll over heads
        # Per-head projections: weights indexed on the leading dim (no lane
        # slicing of activations, no concat at the end).
        qh = jnp.dot(xq, wq_ref[h], preferred_element_type=jnp.float32) * scale
        kh = jnp.dot(xk, wk_ref[h], preferred_element_type=jnp.float32)
        vh = jnp.dot(xv, wv_ref[h], preferred_element_type=jnp.float32)

        qh3 = qh.reshape(bt, seq, head_dim).astype(jnp.bfloat16)
        kh3 = kh.reshape(bt, seq, head_dim).astype(jnp.bfloat16)
        vh3 = vh.reshape(bt, seq, head_dim).astype(jnp.bfloat16)

        # Q @ K^T by contracting the last dims — no explicit transpose (XLU free).
        s = jnp.einsum("bqd,bkd->bqk", qh3, kh3,
                       preferred_element_type=jnp.float32)
        s = jnp.where(valid, s, jnp.float32(-1.0e6))

        # Numerically stable masked softmax; the divide goes to the EUP.
        m = jnp.max(s, axis=-1, keepdims=True)
        p = jnp.exp(s - m)
        l = jnp.sum(p, axis=-1, keepdims=True)
        w = p * pl.reciprocal(l, approx=True)

        o = jnp.einsum("bqk,bkd->bqd", w.astype(jnp.bfloat16), vh3,
                       preferred_element_type=jnp.float32)    # (Bt, seq, d)

        # Output projection accumulated per head:
        #   concat_h(O_h) @ Wo  ==  sum_h O_h @ Wo[h*d:(h+1)*d, :]
        acc += jnp.dot(o.reshape(bt * seq, head_dim).astype(jnp.bfloat16),
                       wo_ref[h], preferred_element_type=jnp.float32)

    out_ref[...] = acc.reshape(bt, seq, H).astype(out_ref.dtype)


def _pick_batch_tile(bs: int, seq: int, target_rows: int = 256) -> int:
    """Largest batch tile that divides bs and keeps Bt*seq near target_rows."""
    bt = max(1, min(bs, target_rows // max(seq, 1)))
    while bs % bt != 0:
        bt -= 1
    return bt


def multi_head_attention(q, k, v, valid_lens, Wq, Wk, Wv, Wo, num_heads,
                         batch_tile=None):
    bs, seq, _ = q.shape
    num_hiddens = Wq.shape[1]
    assert num_hiddens % num_heads == 0
    head_dim = num_hiddens // num_heads

    if batch_tile is None:
        batch_tile = _pick_batch_tile(bs, seq)
    bt = batch_tile
    assert bs % bt == 0
    nbt = bs // bt

    # Head-stacked, bf16 weights (pure JAX pre-processing, outside the kernel).
    def split_heads_w(W):  # (in, H) -> (heads, in, head_dim)
        return W.reshape(W.shape[0], num_heads, head_dim).transpose(1, 0, 2)

    wq_h = split_heads_w(Wq).astype(jnp.bfloat16)
    wk_h = split_heads_w(Wk).astype(jnp.bfloat16)
    wv_h = split_heads_w(Wv).astype(jnp.bfloat16)
    wo_h = Wo.reshape(num_heads, head_dim, num_hiddens).astype(jnp.bfloat16)
    vl = valid_lens.astype(jnp.int32)

    kernel = functools.partial(_mha_kernel, num_heads=num_heads,
                               head_dim=head_dim, batch_tile=bt)
    return pl.pallas_call(
        kernel,
        out_shape=jax.ShapeDtypeStruct((bs, seq, num_hiddens), jnp.float32),
        grid_spec=pltpu.PrefetchScalarGridSpec(
            num_scalar_prefetch=1,
            grid=(nbt,),
            in_specs=[
                pl.BlockSpec((bt, seq, q.shape[-1]), lambda b, vlr: (b, 0, 0)),
                pl.BlockSpec((bt, seq, k.shape[-1]), lambda b, vlr: (b, 0, 0)),
                pl.BlockSpec((bt, seq, v.shape[-1]), lambda b, vlr: (b, 0, 0)),
                pl.BlockSpec(wq_h.shape, lambda b, vlr: (0, 0, 0)),
                pl.BlockSpec(wk_h.shape, lambda b, vlr: (0, 0, 0)),
                pl.BlockSpec(wv_h.shape, lambda b, vlr: (0, 0, 0)),
                pl.BlockSpec(wo_h.shape, lambda b, vlr: (0, 0, 0)),
            ],
            out_specs=pl.BlockSpec((bt, seq, num_hiddens),
                                   lambda b, vlr: (b, 0, 0)),
        ),
        compiler_params=pltpu.CompilerParams(
            dimension_semantics=("parallel",)),   # batch tiles are independent
    )(vl, q, k, v, wq_h, wk_h, wv_h, wo_h)


def _reference_mha(q, k, v, valid_lens, Wq, Wk, Wv, Wo, num_heads):
    """Pure-JAX f32 reference mirroring the PyTorch module (eval mode)."""
    bs, seq, _ = q.shape
    H = Wq.shape[1]
    d = H // num_heads

    def split_heads(x):  # (bs, seq, H) -> (bs*heads, seq, d)
        x = x.reshape(bs, seq, num_heads, d).transpose(0, 2, 1, 3)
        return x.reshape(bs * num_heads, seq, d)

    Q = split_heads(q @ Wq)
    K = split_heads(k @ Wk)
    V = split_heads(v @ Wv)

    vl = jnp.repeat(valid_lens, num_heads)                 # (bs*heads,)
    scores = jnp.einsum("bqd,bkd->bqk", Q, K) / math.sqrt(d)
    col = jnp.arange(seq)[None, None, :]
    scores = jnp.where(col < vl[:, None, None], scores, -1.0e6)
    w = jax.nn.softmax(scores, axis=-1)
    out = jnp.einsum("bqk,bkd->bqd", w, V)                 # (bs*heads, seq, d)
    out = out.reshape(bs, num_heads, seq, d).transpose(0, 2, 1, 3).reshape(bs, seq, H)
    return out @ Wo


if __name__ == "__main__":
    bs, seq = 2, 8
    q_size = k_size = v_size = 16
    num_hiddens, num_heads = 32, 4

    key = jax.random.PRNGKey(0)
    kq, kk, kv, kwq, kwk, kwv, kwo = jax.random.split(key, 7)

    q = jax.random.normal(kq, (bs, seq, q_size), dtype=jnp.float32)
    k = jax.random.normal(kk, (bs, seq, k_size), dtype=jnp.float32)
    v = jax.random.normal(kv, (bs, seq, v_size), dtype=jnp.float32)
    valid_lens = jnp.array([5, 8], dtype=jnp.int32)        # (bs,)

    # Deterministic parameter init (Linear weights stored as (in, out)).
    Wq = 0.1 * jax.random.normal(kwq, (q_size, num_hiddens), dtype=jnp.float32)
    Wk = 0.1 * jax.random.normal(kwk, (k_size, num_hiddens), dtype=jnp.float32)
    Wv = 0.1 * jax.random.normal(kwv, (v_size, num_hiddens), dtype=jnp.float32)
    Wo = 0.1 * jax.random.normal(kwo, (num_hiddens, num_hiddens), dtype=jnp.float32)

    out = multi_head_attention(q, k, v, valid_lens, Wq, Wk, Wv, Wo, num_heads)
    out = jax.block_until_ready(out)

    ref = _reference_mha(q, k, v, valid_lens, Wq, Wk, Wv, Wo, num_heads)
    assert out.shape == (bs, seq, num_hiddens)
    # bf16 MXU operands + approximate EUP reciprocal -> loosened tolerance.
    assert jnp.allclose(out, ref, atol=2e-2, rtol=2e-2), "mismatch vs reference"

    print("KERNEL_OK")
</pallas_src>

<mosaic_0001>
module attributes {stable_mosaic.version = 11 : i64} {
  func.func @_mha_kernel(%arg0: i32, %arg1: memref<2xi32, #tpu.memory_space<smem>>, %arg2: memref<2x8x16xf32, #tpu.memory_space<vmem>>, %arg3: memref<2x8x16xf32, #tpu.memory_space<vmem>>, %arg4: memref<2x8x16xf32, #tpu.memory_space<vmem>>, %arg5: memref<4x16x8xbf16, #tpu.memory_space<vmem>>, %arg6: memref<4x16x8xbf16, #tpu.memory_space<vmem>>, %arg7: memref<4x16x8xbf16, #tpu.memory_space<vmem>>, %arg8: memref<4x8x32xbf16, #tpu.memory_space<vmem>>, %arg9: memref<2x8x32xf32, #tpu.memory_space<vmem>>) attributes {dimension_semantics = [#tpu.dimension_semantics<parallel>], iteration_bounds = array<i64: 1>, scalar_prefetch = 1 : i64, scratch_operands = 0 : i64, tpu.core_type = #tpu.core_type<tc>, window_params = [{transform_indices = @transform_0, window_bounds = array<i64: 2, 8, 16>}, {transform_indices = @transform_1, window_bounds = array<i64: 2, 8, 16>}, {transform_indices = @transform_2, window_bounds = array<i64: 2, 8, 16>}, {pipeline_mode = #tpu.pipeline_mode<synchronous>, transform_indices = @transform_3, window_bounds = array<i64: 4, 16, 8>}, {pipeline_mode = #tpu.pipeline_mode<synchronous>, transform_indices = @transform_4, window_bounds = array<i64: 4, 16, 8>}, {pipeline_mode = #tpu.pipeline_mode<synchronous>, transform_indices = @transform_5, window_bounds = array<i64: 4, 16, 8>}, {pipeline_mode = #tpu.pipeline_mode<synchronous>, transform_indices = @transform_6, window_bounds = array<i64: 4, 8, 32>}, {transform_indices = @transform_7, window_bounds = array<i64: 2, 8, 32>}]} {
    %c2_i32 = arith.constant 2 : i32
    %0 = arith.muli %arg0, %c2_i32 : i32
    %c0 = arith.constant 0 : index
    %c0_0 = arith.constant 0 : index
    %c0_1 = arith.constant 0 : index
    %1 = vector.load %arg2[%c0, %c0_0, %c0_1] : memref<2x8x16xf32, #tpu.memory_space<vmem>>, vector<2x8x16xf32>
    %2 = vector.shape_cast %1 : vector<2x8x16xf32> to vector<16x16xf32>
    %3 = arith.truncf %2 : vector<16x16xf32> to vector<16x16xbf16>
    %c0_2 = arith.constant 0 : index
    %c0_3 = arith.constant 0 : index
    %c0_4 = arith.constant 0 : index
    %4 = vector.load %arg3[%c0_2, %c0_3, %c0_4] : memref<2x8x16xf32, #tpu.memory_space<vmem>>, vector<2x8x16xf32>
    %5 = vector.shape_cast %4 : vector<2x8x16xf32> to vector<16x16xf32>
    %6 = arith.truncf %5 : vector<16x16xf32> to vector<16x16xbf16>
    %c0_5 = arith.constant 0 : index
    %c0_6 = arith.constant 0 : index
    %c0_7 = arith.constant 0 : index
    %7 = vector.load %arg4[%c0_5, %c0_6, %c0_7] : memref<2x8x16xf32, #tpu.memory_space<vmem>>, vector<2x8x16xf32>
    %8 = vector.shape_cast %7 : vector<2x8x16xf32> to vector<16x16xf32>
    %9 = arith.truncf %8 : vector<16x16xf32> to vector<16x16xbf16>
    %10 = tpu.iota {dimensions = array<i32: 2>} : vector<2x8x8xi32>
    %11 = tpu.iota {dimensions = array<i32: 0>} : vector<2x8x8xi32>
    %c0_i32 = arith.constant 0 : i32
    %12 = vector.broadcast %c0_i32 : i32 to vector<2x8x8xi32>
    %c0_i32_8 = arith.constant 0 : i32
    %13 = vector.broadcast %c0_i32_8 : i32 to vector<2x8x8xi32>
    %14 = arith.cmpi eq, %11, %13 : vector<2x8x8xi32>
    %c0_i32_9 = arith.constant 0 : i32
    %15 = arith.addi %0, %c0_i32_9 : i32
    %16 = arith.index_cast %15 : i32 to index
    %17 = memref.load %arg1[%16] : memref<2xi32, #tpu.memory_space<smem>>
    %18 = vector.broadcast %17 : i32 to vector<2x8x8xi32>
    %19 = arith.select %14, %18, %12 : vector<2x8x8xi1>, vector<2x8x8xi32>
    %c1_i32 = arith.constant 1 : i32
    %20 = vector.broadcast %c1_i32 : i32 to vector<2x8x8xi32>
    %21 = arith.cmpi eq, %11, %20 : vector<2x8x8xi32>
    %c1_i32_10 = arith.constant 1 : i32
    %22 = arith.addi %0, %c1_i32_10 : i32
    %23 = arith.index_cast %22 : i32 to index
    %24 = memref.load %arg1[%23] : memref<2xi32, #tpu.memory_space<smem>>
    %25 = vector.broadcast %24 : i32 to vector<2x8x8xi32>
    %26 = arith.select %21, %25, %19 : vector<2x8x8xi1>, vector<2x8x8xi32>
    %27 = arith.cmpi slt, %10, %26 : vector<2x8x8xi32>
    %cst = arith.constant 0.000000e+00 : f32
    %28 = vector.broadcast %cst : f32 to vector<16x32xf32>
    %c0_11 = arith.constant 0 : index
    %c0_12 = arith.constant 0 : index
    %c0_13 = arith.constant 0 : index
    %29 = vector.load %arg5[%c0_11, %c0_12, %c0_13] : memref<4x16x8xbf16, #tpu.memory_space<vmem>>, vector<1x16x8xbf16>
    %30 = vector.shape_cast %29 : vector<1x16x8xbf16> to vector<16x8xbf16>
    %cst_14 = arith.constant dense<0.000000e+00> : vector<16x8xf32>
    %31 = tpu.matmul %3, %30, %cst_14 {dimension_numbers = #tpu.dot_dimension_numbers<[1], [0], [0], [1], [0, 0, 1, 1], [], []>} : vector<16x16xbf16>, vector<16x8xbf16>, vector<16x8xf32> -> vector<16x8xf32>
    %cst_15 = arith.constant 0.353553385 : f32
    %32 = vector.broadcast %cst_15 : f32 to vector<16x8xf32>
    %33 = arith.mulf %31, %32 : vector<16x8xf32>
    %c0_16 = arith.constant 0 : index
    %c0_17 = arith.constant 0 : index
    %c0_18 = arith.constant 0 : index
    %34 = vector.load %arg6[%c0_16, %c0_17, %c0_18] : memref<4x16x8xbf16, #tpu.memory_space<vmem>>, vector<1x16x8xbf16>
    %35 = vector.shape_cast %34 : vector<1x16x8xbf16> to vector<16x8xbf16>
    %cst_19 = arith.constant dense<0.000000e+00> : vector<16x8xf32>
    %36 = tpu.matmul %6, %35, %cst_19 {dimension_numbers = #tpu.dot_dimension_numbers<[1], [0], [0], [1], [0, 0, 1, 1], [], []>} : vector<16x16xbf16>, vector<16x8xbf16>, vector<16x8xf32> -> vector<16x8xf32>
    %c0_20 = arith.constant 0 : index
    %c0_21 = arith.constant 0 : index
    %c0_22 = arith.constant 0 : index
    %37 = vector.load %arg7[%c0_20, %c0_21, %c0_22] : memref<4x16x8xbf16, #tpu.memory_space<vmem>>, vector<1x16x8xbf16>
    %38 = vector.shape_cast %37 : vector<1x16x8xbf16> to vector<16x8xbf16>
    %cst_23 = arith.constant dense<0.000000e+00> : vector<16x8xf32>
    %39 = tpu.matmul %9, %38, %cst_23 {dimension_numbers = #tpu.dot_dimension_numbers<[1], [0], [0], [1], [0, 0, 1, 1], [], []>} : vector<16x16xbf16>, vector<16x8xbf16>, vector<16x8xf32> -> vector<16x8xf32>
    %40 = vector.shape_cast %33 : vector<16x8xf32> to vector<2x8x8xf32>
    %41 = arith.truncf %40 : vector<2x8x8xf32> to vector<2x8x8xbf16>
    %42 = vector.shape_cast %36 : vector<16x8xf32> to vector<2x8x8xf32>
    %43 = arith.truncf %42 : vector<2x8x8xf32> to vector<2x8x8xbf16>
    %44 = vector.shape_cast %39 : vector<16x8xf32> to vector<2x8x8xf32>
    %45 = arith.truncf %44 : vector<2x8x8xf32> to vector<2x8x8xbf16>
    "tpu.trace_start"() <{level = 10 : i32, message = "bqd,bkd->bqk"}> : () -> ()
    %cst_24 = arith.constant dense<0.000000e+00> : vector<2x8x8xf32>
    %46 = tpu.matmul %41, %43, %cst_24 {dimension_numbers = #tpu.dot_dimension_numbers<[2], [2], [1], [1], [0, 0, 0, 1, 1, 1], [0], [0]>} : vector<2x8x8xbf16>, vector<2x8x8xbf16>, vector<2x8x8xf32> -> vector<2x8x8xf32>
    %cst_25 = arith.constant -1.000000e+06 : f32
    "tpu.trace_stop"() : () -> ()
    %47 = vector.broadcast %cst_25 : f32 to vector<2x8x8xf32>
    %48 = arith.select %27, %46, %47 : vector<2x8x8xi1>, vector<2x8x8xf32>
    %cst_26 = arith.constant dense<0xFF800000> : vector<2x8xf32>
    %49 = vector.multi_reduction <maximumf>, %48, %cst_26 [2] : vector<2x8x8xf32> to vector<2x8xf32>
    %50 = vector.shape_cast %49 : vector<2x8xf32> to vector<2x8x1xf32>
    %51 = vector.broadcast %50 : vector<2x8x1xf32> to vector<2x8x8xf32>
    %52 = arith.subf %48, %51 : vector<2x8x8xf32>
    %53 = math.exp %52 : vector<2x8x8xf32>
    %cst_27 = arith.constant dense<0.000000e+00> : vector<2x8xf32>
    %54 = vector.multi_reduction <add>, %53, %cst_27 [2] : vector<2x8x8xf32> to vector<2x8xf32>
    %55 = vector.shape_cast %54 : vector<2x8xf32> to vector<2x8x1xf32>
    %56 = tpu.reciprocal %55 {approx = true} : vector<2x8x1xf32> -> vector<2x8x1xf32>
    %57 = vector.broadcast %56 : vector<2x8x1xf32> to vector<2x8x8xf32>
    %58 = arith.mulf %53, %57 : vector<2x8x8xf32>
    %59 = arith.truncf %58 : vector<2x8x8xf32> to vector<2x8x8xbf16>
    "tpu.trace_start"() <{level = 10 : i32, message = "bqk,bkd->bqd"}> : () -> ()
    %cst_28 = arith.constant dense<0.000000e+00> : vector<2x8x8xf32>
    %60 = tpu.matmul %59, %45, %cst_28 {dimension_numbers = #tpu.dot_dimension_numbers<[2], [1], [1], [2], [0, 0, 0, 1, 1, 2], [0], [0]>} : vector<2x8x8xbf16>, vector<2x8x8xbf16>, vector<2x8x8xf32> -> vector<2x8x8xf32>
    "tpu.trace_stop"() : () -> ()
    %61 = vector.shape_cast %60 : vector<2x8x8xf32> to vector<16x8xf32>
    %62 = arith.truncf %61 : vector<16x8xf32> to vector<16x8xbf16>
    %c0_29 = arith.constant 0 : index
    %c0_30 = arith.constant 0 : index
    %c0_31 = arith.constant 0 : index
    %63 = vector.load %arg8[%c0_29, %c0_30, %c0_31] : memref<4x8x32xbf16, #tpu.memory_space<vmem>>, vector<1x8x32xbf16>
    %64 = vector.shape_cast %63 : vector<1x8x32xbf16> to vector<8x32xbf16>
    %cst_32 = arith.constant dense<0.000000e+00> : vector<16x32xf32>
    %65 = tpu.matmul %62, %64, %cst_32 {dimension_numbers = #tpu.dot_dimension_numbers<[1], [0], [0], [1], [0, 0, 1, 1], [], []>} : vector<16x8xbf16>, vector<8x32xbf16>, vector<16x32xf32> -> vector<16x32xf32>
    %66 = arith.addf %28, %65 : vector<16x32xf32>
    %c1 = arith.constant 1 : index
    %c0_33 = arith.constant 0 : index
    %c0_34 = arith.constant 0 : index
    %67 = vector.load %arg5[%c1, %c0_33, %c0_34] : memref<4x16x8xbf16, #tpu.memory_space<vmem>>, vector<1x16x8xbf16>
    %68 = vector.shape_cast %67 : vector<1x16x8xbf16> to vector<16x8xbf16>
    %cst_35 = arith.constant dense<0.000000e+00> : vector<16x8xf32>
    %69 = tpu.matmul %3, %68, %cst_35 {dimension_numbers = #tpu.dot_dimension_numbers<[1], [0], [0], [1], [0, 0, 1, 1], [], []>} : vector<16x16xbf16>, vector<16x8xbf16>, vector<16x8xf32> -> vector<16x8xf32>
    %cst_36 = arith.constant 0.353553385 : f32
    %70 = vector.broadcast %cst_36 : f32 to vector<16x8xf32>
    %71 = arith.mulf %69, %70 : vector<16x8xf32>
    %c1_37 = arith.constant 1 : index
    %c0_38 = arith.constant 0 : index
    %c0_39 = arith.constant 0 : index
    %72 = vector.load %arg6[%c1_37, %c0_38, %c0_39] : memref<4x16x8xbf16, #tpu.memory_space<vmem>>, vector<1x16x8xbf16>
    %73 = vector.shape_cast %72 : vector<1x16x8xbf16> to vector<16x8xbf16>
    %cst_40 = arith.constant dense<0.000000e+00> : vector<16x8xf32>
    %74 = tpu.matmul %6, %73, %cst_40 {dimension_numbers = #tpu.dot_dimension_numbers<[1], [0], [0], [1], [0, 0, 1, 1], [], []>} : vector<16x16xbf16>, vector<16x8xbf16>, vector<16x8xf32> -> vector<16x8xf32>
    %c1_41 = arith.constant 1 : index
    %c0_42 = arith.constant 0 : index
    %c0_43 = arith.constant 0 : index
    %75 = vector.load %arg7[%c1_41, %c0_42, %c0_43] : memref<4x16x8xbf16, #tpu.memory_space<vmem>>, vector<1x16x8xbf16>
    %76 = vector.shape_cast %75 : vector<1x16x8xbf16> to vector<16x8xbf16>
    %cst_44 = arith.constant dense<0.000000e+00> : vector<16x8xf32>
    %77 = tpu.matmul %9, %76, %cst_44 {dimension_numbers = #tpu.dot_dimension_numbers<[1], [0], [0], [1], [0, 0, 1, 1], [], []>} : vector<16x16xbf16>, vector<16x8xbf16>, vector<16x8xf32> -> vector<16x8xf32>
    %78 = vector.shape_cast %71 : vector<16x8xf32> to vector<2x8x8xf32>
    %79 = arith.truncf %78 : vector<2x8x8xf32> to vector<2x8x8xbf16>
    %80 = vector.shape_cast %74 : vector<16x8xf32> to vector<2x8x8xf32>
    %81 = arith.truncf %80 : vector<2x8x8xf32> to vector<2x8x8xbf16>
    %82 = vector.shape_cast %77 : vector<16x8xf32> to vector<2x8x8xf32>
    %83 = arith.truncf %82 : vector<2x8x8xf32> to vector<2x8x8xbf16>
    "tpu.trace_start"() <{level = 10 : i32, message = "bqd,bkd->bqk"}> : () -> ()
    %cst_45 = arith.constant dense<0.000000e+00> : vector<2x8x8xf32>
    %84 = tpu.matmul %79, %81, %cst_45 {dimension_numbers = #tpu.dot_dimension_numbers<[2], [2], [1], [1], [0, 0, 0, 1, 1, 1], [0], [0]>} : vector<2x8x8xbf16>, vector<2x8x8xbf16>, vector<2x8x8xf32> -> vector<2x8x8xf32>
    %cst_46 = arith.constant -1.000000e+06 : f32
    "tpu.trace_stop"() : () -> ()
    %85 = vector.broadcast %cst_46 : f32 to vector<2x8x8xf32>
    %86 = arith.select %27, %84, %85 : vector<2x8x8xi1>, vector<2x8x8xf32>
    %cst_47 = arith.constant dense<0xFF800000> : vector<2x8xf32>
    %87 = vector.multi_reduction <maximumf>, %86, %cst_47 [2] : vector<2x8x8xf32> to vector<2x8xf32>
    %88 = vector.shape_cast %87 : vector<2x8xf32> to vector<2x8x1xf32>
    %89 = vector.broadcast %88 : vector<2x8x1xf32> to vector<2x8x8xf32>
    %90 = arith.subf %86, %89 : vector<2x8x8xf32>
    %91 = math.exp %90 : vector<2x8x8xf32>
    %cst_48 = arith.constant dense<0.000000e+00> : vector<2x8xf32>
    %92 = vector.multi_reduction <add>, %91, %cst_48 [2] : vector<2x8x8xf32> to vector<2x8xf32>
    %93 = vector.shape_cast %92 : vector<2x8xf32> to vector<2x8x1xf32>
    %94 = tpu.reciprocal %93 {approx = true} : vector<2x8x1xf32> -> vector<2x8x1xf32>
    %95 = vector.broadcast %94 : vector<2x8x1xf32> to vector<2x8x8xf32>
    %96 = arith.mulf %91, %95 : vector<2x8x8xf32>
    %97 = arith.truncf %96 : vector<2x8x8xf32> to vector<2x8x8xbf16>
    "tpu.trace_start"() <{level = 10 : i32, message = "bqk,bkd->bqd"}> : () -> ()
    %cst_49 = arith.constant dense<0.000000e+00> : vector<2x8x8xf32>
    %98 = tpu.matmul %97, %83, %cst_49 {dimension_numbers = #tpu.dot_dimension_numbers<[2], [1], [1], [2], [0, 0, 0, 1, 1, 2], [0], [0]>} : vector<2x8x8xbf16>, vector<2x8x8xbf16>, vector<2x8x8xf32> -> vector<2x8x8xf32>
    "tpu.trace_stop"() : () -> ()
    %99 = vector.shape_cast %98 : vector<2x8x8xf32> to vector<16x8xf32>
    %100 = arith.truncf %99 : vector<16x8xf32> to vector<16x8xbf16>
    %c1_50 = arith.constant 1 : index
    %c0_51 = arith.constant 0 : index
    %c0_52 = arith.constant 0 : index
    %101 = vector.load %arg8[%c1_50, %c0_51, %c0_52] : memref<4x8x32xbf16, #tpu.memory_space<vmem>>, vector<1x8x32xbf16>
    %102 = vector.shape_cast %101 : vector<1x8x32xbf16> to vector<8x32xbf16>
    %cst_53 = arith.constant dense<0.000000e+00> : vector<16x32xf32>
    %103 = tpu.matmul %100, %102, %cst_53 {dimension_numbers = #tpu.dot_dimension_numbers<[1], [0], [0], [1], [0, 0, 1, 1], [], []>} : vector<16x8xbf16>, vector<8x32xbf16>, vector<16x32xf32> -> vector<16x32xf32>
    %104 = arith.addf %66, %103 : vector<16x32xf32>
    %c2 = arith.constant 2 : index
    %c0_54 = arith.constant 0 : index
    %c0_55 = arith.constant 0 : index
    %105 = vector.load %arg5[%c2, %c0_54, %c0_55] : memref<4x16x8xbf16, #tpu.memory_space<vmem>>, vector<1x16x8xbf16>
    %106 = vector.shape_cast %105 : vector<1x16x8xbf16> to vector<16x8xbf16>
    %cst_56 = arith.constant dense<0.000000e+00> : vector<16x8xf32>
    %107 = tpu.matmul %3, %106, %cst_56 {dimension_numbers = #tpu.dot_dimension_numbers<[1], [0], [0], [1], [0, 0, 1, 1], [], []>} : vector<16x16xbf16>, vector<16x8xbf16>, vector<16x8xf32> -> vector<16x8xf32>
    %cst_57 = arith.constant 0.353553385 : f32
    %108 = vector.broadcast %cst_57 : f32 to vector<16x8xf32>
    %109 = arith.mulf %107, %108 : vector<16x8xf32>
    %c2_58 = arith.constant 2 : index
    %c0_59 = arith.constant 0 : index
    %c0_60 = arith.constant 0 : index
    %110 = vector.load %arg6[%c2_58, %c0_59, %c0_60] : memref<4x16x8xbf16, #tpu.memory_space<vmem>>, vector<1x16x8xbf16>
    %111 = vector.shape_cast %110 : vector<1x16x8xbf16> to vector<16x8xbf16>
    %cst_61 = arith.constant dense<0.000000e+00> : vector<16x8xf32>
    %112 = tpu.matmul %6, %111, %cst_61 {dimension_numbers = #tpu.dot_dimension_numbers<[1], [0], [0], [1], [0, 0, 1, 1], [], []>} : vector<16x16xbf16>, vector<16x8xbf16>, vector<16x8xf32> -> vector<16x8xf32>
    %c2_62 = arith.constant 2 : index
    %c0_63 = arith.constant 0 : index
    %c0_64 = arith.constant 0 : index
    %113 = vector.load %arg7[%c2_62, %c0_63, %c0_64] : memref<4x16x8xbf16, #tpu.memory_space<vmem>>, vector<1x16x8xbf16>
    %114 = vector.shape_cast %113 : vector<1x16x8xbf16> to vector<16x8xbf16>
    %cst_65 = arith.constant dense<0.000000e+00> : vector<16x8xf32>
    %115 = tpu.matmul %9, %114, %cst_65 {dimension_numbers = #tpu.dot_dimension_numbers<[1], [0], [0], [1], [0, 0, 1, 1], [], []>} : vector<16x16xbf16>, vector<16x8xbf16>, vector<16x8xf32> -> vector<16x8xf32>
    %116 = vector.shape_cast %109 : vector<16x8xf32> to vector<2x8x8xf32>
    %117 = arith.truncf %116 : vector<2x8x8xf32> to vector<2x8x8xbf16>
    %118 = vector.shape_cast %112 : vector<16x8xf32> to vector<2x8x8xf32>
    %119 = arith.truncf %118 : vector<2x8x8xf32> to vector<2x8x8xbf16>
    %120 = vector.shape_cast %115 : vector<16x8xf32> to vector<2x8x8xf32>
    %121 = arith.truncf %120 : vector<2x8x8xf32> to vector<2x8x8xbf16>
    "tpu.trace_start"() <{level = 10 : i32, message = "bqd,bkd->bqk"}> : () -> ()
    %cst_66 = arith.constant dense<0.000000e+00> : vector<2x8x8xf32>
    %122 = tpu.matmul %117, %119, %cst_66 {dimension_numbers = #tpu.dot_dimension_numbers<[2], [2], [1], [1], [0, 0, 0, 1, 1, 1], [0], [0]>} : vector<2x8x8xbf16>, vector<2x8x8xbf16>, vector<2x8x8xf32> -> vector<2x8x8xf32>
    %cst_67 = arith.constant -1.000000e+06 : f32
    "tpu.trace_stop"() : () -> ()
    %123 = vector.broadcast %cst_67 : f32 to vector<2x8x8xf32>
    %124 = arith.select %27, %122, %123 : vector<2x8x8xi1>, vector<2x8x8xf32>
    %cst_68 = arith.constant dense<0xFF800000> : vector<2x8xf32>
    %125 = vector.multi_reduction <maximumf>, %124, %cst_68 [2] : vector<2x8x8xf32> to vector<2x8xf32>
    %126 = vector.shape_cast %125 : vector<2x8xf32> to vector<2x8x1xf32>
    %127 = vector.broadcast %126 : vector<2x8x1xf32> to vector<2x8x8xf32>
    %128 = arith.subf %124, %127 : vector<2x8x8xf32>
    %129 = math.exp %128 : vector<2x8x8xf32>
    %cst_69 = arith.constant dense<0.000000e+00> : vector<2x8xf32>
    %130 = vector.multi_reduction <add>, %129, %cst_69 [2] : vector<2x8x8xf32> to vector<2x8xf32>
    %131 = vector.shape_cast %130 : vector<2x8xf32> to vector<2x8x1xf32>
    %132 = tpu.reciprocal %131 {approx = true} : vector<2x8x1xf32> -> vector<2x8x1xf32>
    %133 = vector.broadcast %132 : vector<2x8x1xf32> to vector<2x8x8xf32>
    %134 = arith.mulf %129, %133 : vector<2x8x8xf32>
    %135 = arith.truncf %134 : vector<2x8x8xf32> to vector<2x8x8xbf16>
    "tpu.trace_start"() <{level = 10 : i32, message = "bqk,bkd->bqd"}> : () -> ()
    %cst_70 = arith.constant dense<0.000000e+00> : vector<2x8x8xf32>
    %136 = tpu.matmul %135, %121, %cst_70 {dimension_numbers = #tpu.dot_dimension_numbers<[2], [1], [1], [2], [0, 0, 0, 1, 1, 2], [0], [0]>} : vector<2x8x8xbf16>, vector<2x8x8xbf16>, vector<2x8x8xf32> -> vector<2x8x8xf32>
    "tpu.trace_stop"() : () -> ()
    %137 = vector.shape_cast %136 : vector<2x8x8xf32> to vector<16x8xf32>
    %138 = arith.truncf %137 : vector<16x8xf32> to vector<16x8xbf16>
    %c2_71 = arith.constant 2 : index
    %c0_72 = arith.constant 0 : index
    %c0_73 = arith.constant 0 : index
    %139 = vector.load %arg8[%c2_71, %c0_72, %c0_73] : memref<4x8x32xbf16, #tpu.memory_space<vmem>>, vector<1x8x32xbf16>
    %140 = vector.shape_cast %139 : vector<1x8x32xbf16> to vector<8x32xbf16>
    %cst_74 = arith.constant dense<0.000000e+00> : vector<16x32xf32>
    %141 = tpu.matmul %138, %140, %cst_74 {dimension_numbers = #tpu.dot_dimension_numbers<[1], [0], [0], [1], [0, 0, 1, 1], [], []>} : vector<16x8xbf16>, vector<8x32xbf16>, vector<16x32xf32> -> vector<16x32xf32>
    %142 = arith.addf %104, %141 : vector<16x32xf32>
    %c3 = arith.constant 3 : index
    %c0_75 = arith.constant 0 : index
    %c0_76 = arith.constant 0 : index
    %143 = vector.load %arg5[%c3, %c0_75, %c0_76] : memref<4x16x8xbf16, #tpu.memory_space<vmem>>, vector<1x16x8xbf16>
    %144 = vector.shape_cast %143 : vector<1x16x8xbf16> to vector<16x8xbf16>
    %cst_77 = arith.constant dense<0.000000e+00> : vector<16x8xf32>
    %145 = tpu.matmul %3, %144, %cst_77 {dimension_numbers = #tpu.dot_dimension_numbers<[1], [0], [0], [1], [0, 0, 1, 1], [], []>} : vector<16x16xbf16>, vector<16x8xbf16>, vector<16x8xf32> -> vector<16x8xf32>
    %cst_78 = arith.constant 0.353553385 : f32
    %146 = vector.broadcast %cst_78 : f32 to vector<16x8xf32>
    %147 = arith.mulf %145, %146 : vector<16x8xf32>
    %c3_79 = arith.constant 3 : index
    %c0_80 = arith.constant 0 : index
    %c0_81 = arith.constant 0 : index
    %148 = vector.load %arg6[%c3_79, %c0_80, %c0_81] : memref<4x16x8xbf16, #tpu.memory_space<vmem>>, vector<1x16x8xbf16>
    %149 = vector.shape_cast %148 : vector<1x16x8xbf16> to vector<16x8xbf16>
    %cst_82 = arith.constant dense<0.000000e+00> : vector<16x8xf32>
    %150 = tpu.matmul %6, %149, %cst_82 {dimension_numbers = #tpu.dot_dimension_numbers<[1], [0], [0], [1], [0, 0, 1, 1], [], []>} : vector<16x16xbf16>, vector<16x8xbf16>, vector<16x8xf32> -> vector<16x8xf32>
    %c3_83 = arith.constant 3 : index
    %c0_84 = arith.constant 0 : index
    %c0_85 = arith.constant 0 : index
    %151 = vector.load %arg7[%c3_83, %c0_84, %c0_85] : memref<4x16x8xbf16, #tpu.memory_space<vmem>>, vector<1x16x8xbf16>
    %152 = vector.shape_cast %151 : vector<1x16x8xbf16> to vector<16x8xbf16>
    %cst_86 = arith.constant dense<0.000000e+00> : vector<16x8xf32>
    %153 = tpu.matmul %9, %152, %cst_86 {dimension_numbers = #tpu.dot_dimension_numbers<[1], [0], [0], [1], [0, 0, 1, 1], [], []>} : vector<16x16xbf16>, vector<16x8xbf16>, vector<16x8xf32> -> vector<16x8xf32>
    %154 = vector.shape_cast %147 : vector<16x8xf32> to vector<2x8x8xf32>
    %155 = arith.truncf %154 : vector<2x8x8xf32> to vector<2x8x8xbf16>
    %156 = vector.shape_cast %150 : vector<16x8xf32> to vector<2x8x8xf32>
    %157 = arith.truncf %156 : vector<2x8x8xf32> to vector<2x8x8xbf16>
    %158 = vector.shape_cast %153 : vector<16x8xf32> to vector<2x8x8xf32>
    %159 = arith.truncf %158 : vector<2x8x8xf32> to vector<2x8x8xbf16>
    "tpu.trace_start"() <{level = 10 : i32, message = "bqd,bkd->bqk"}> : () -> ()
    %cst_87 = arith.constant dense<0.000000e+00> : vector<2x8x8xf32>
    %160 = tpu.matmul %155, %157, %cst_87 {dimension_numbers = #tpu.dot_dimension_numbers<[2], [2], [1], [1], [0, 0, 0, 1, 1, 1], [0], [0]>} : vector<2x8x8xbf16>, vector<2x8x8xbf16>, vector<2x8x8xf32> -> vector<2x8x8xf32>
    %cst_88 = arith.constant -1.000000e+06 : f32
    "tpu.trace_stop"() : () -> ()
    %161 = vector.broadcast %cst_88 : f32 to vector<2x8x8xf32>
    %162 = arith.select %27, %160, %161 : vector<2x8x8xi1>, vector<2x8x8xf32>
    %cst_89 = arith.constant dense<0xFF800000> : vector<2x8xf32>
    %163 = vector.multi_reduction <maximumf>, %162, %cst_89 [2] : vector<2x8x8xf32> to vector<2x8xf32>
    %164 = vector.shape_cast %163 : vector<2x8xf32> to vector<2x8x1xf32>
    %165 = vector.broadcast %164 : vector<2x8x1xf32> to vector<2x8x8xf32>
    %166 = arith.subf %162, %165 : vector<2x8x8xf32>
    %167 = math.exp %166 : vector<2x8x8xf32>
    %cst_90 = arith.constant dense<0.000000e+00> : vector<2x8xf32>
    %168 = vector.multi_reduction <add>, %167, %cst_90 [2] : vector<2x8x8xf32> to vector<2x8xf32>
    %169 = vector.shape_cast %168 : vector<2x8xf32> to vector<2x8x1xf32>
    %170 = tpu.reciprocal %169 {approx = true} : vector<2x8x1xf32> -> vector<2x8x1xf32>
    %171 = vector.broadcast %170 : vector<2x8x1xf32> to vector<2x8x8xf32>
    %172 = arith.mulf %167, %171 : vector<2x8x8xf32>
    %173 = arith.truncf %172 : vector<2x8x8xf32> to vector<2x8x8xbf16>
    "tpu.trace_start"() <{level = 10 : i32, message = "bqk,bkd->bqd"}> : () -> ()
    %cst_91 = arith.constant dense<0.000000e+00> : vector<2x8x8xf32>
    %174 = tpu.matmul %173, %159, %cst_91 {dimension_numbers = #tpu.dot_dimension_numbers<[2], [1], [1], [2], [0, 0, 0, 1, 1, 2], [0], [0]>} : vector<2x8x8xbf16>, vector<2x8x8xbf16>, vector<2x8x8xf32> -> vector<2x8x8xf32>
    "tpu.trace_stop"() : () -> ()
    %175 = vector.shape_cast %174 : vector<2x8x8xf32> to vector<16x8xf32>
    %176 = arith.truncf %175 : vector<16x8xf32> to vector<16x8xbf16>
    %c3_92 = arith.constant 3 : index
    %c0_93 = arith.constant 0 : index
    %c0_94 = arith.constant 0 : index
    %177 = vector.load %arg8[%c3_92, %c0_93, %c0_94] : memref<4x8x32xbf16, #tpu.memory_space<vmem>>, vector<1x8x32xbf16>
    %178 = vector.shape_cast %177 : vector<1x8x32xbf16> to vector<8x32xbf16>
    %cst_95 = arith.constant dense<0.000000e+00> : vector<16x32xf32>
    %179 = tpu.matmul %176, %178, %cst_95 {dimension_numbers = #tpu.dot_dimension_numbers<[1], [0], [0], [1], [0, 0, 1, 1], [], []>} : vector<16x8xbf16>, vector<8x32xbf16>, vector<16x32xf32> -> vector<16x32xf32>
    %180 = arith.addf %142, %179 : vector<16x32xf32>
    %181 = vector.shape_cast %180 : vector<16x32xf32> to vector<2x8x32xf32>
    %c0_96 = arith.constant 0 : index
    %c0_97 = arith.constant 0 : index
    %c0_98 = arith.constant 0 : index
    %182 = vector.load %arg9[%c0_96, %c0_97, %c0_98] : memref<2x8x32xf32, #tpu.memory_space<vmem>>, vector<2x8x32xf32>
    tpu.vector_store %arg9[%c0_96, %c0_97, %c0_98], %181 {strides = array<i32>} : memref<2x8x32xf32, #tpu.memory_space<vmem>>, vector<2x8x32xf32>,
    return
  }
  func.func @transform_0(%arg0: i32, %arg1: memref<2xi32, #tpu.memory_space<smem>>) -> (i32, i32, i32) {
    %c0_i32 = arith.constant 0 : i32
    %c0_i32_0 = arith.constant 0 : i32
    %c0_i32_1 = arith.constant 0 : i32
    return %arg0, %c0_i32, %c0_i32_0 : i32, i32, i32
  }
  func.func @transform_1(%arg0: i32, %arg1: memref<2xi32, #tpu.memory_space<smem>>) -> (i32, i32, i32) {
    %c0_i32 = arith.constant 0 : i32
    %c0_i32_0 = arith.constant 0 : i32
    %c0_i32_1 = arith.constant 0 : i32
    return %arg0, %c0_i32, %c0_i32_0 : i32, i32, i32
  }
  func.func @transform_2(%arg0: i32, %arg1: memref<2xi32, #tpu.memory_space<smem>>) -> (i32, i32, i32) {
    %c0_i32 = arith.constant 0 : i32
    %c0_i32_0 = arith.constant 0 : i32
    %c0_i32_1 = arith.constant 0 : i32
    return %arg0, %c0_i32, %c0_i32_0 : i32, i32, i32
  }
  func.func @transform_3(%arg0: i32, %arg1: memref<2xi32, #tpu.memory_space<smem>>) -> (i32, i32, i32) {
    %c0_i32 = arith.constant 0 : i32
    %c0_i32_0 = arith.constant 0 : i32
    %c0_i32_1 = arith.constant 0 : i32
    %c0_i32_2 = arith.constant 0 : i32
    return %c0_i32, %c0_i32_0, %c0_i32_1 : i32, i32, i32
  }
  func.func @transform_4(%arg0: i32, %arg1: memref<2xi32, #tpu.memory_space<smem>>) -> (i32, i32, i32) {
    %c0_i32 = arith.constant 0 : i32
    %c0_i32_0 = arith.constant 0 : i32
    %c0_i32_1 = arith.constant 0 : i32
    %c0_i32_2 = arith.constant 0 : i32
    return %c0_i32, %c0_i32_0, %c0_i32_1 : i32, i32, i32
  }
  func.func @transform_5(%arg0: i32, %arg1: memref<2xi32, #tpu.memory_space<smem>>) -> (i32, i32, i32) {
    %c0_i32 = arith.constant 0 : i32
    %c0_i32_0 = arith.constant 0 : i32
    %c0_i32_1 = arith.constant 0 : i32
    %c0_i32_2 = arith.constant 0 : i32
    return %c0_i32, %c0_i32_0, %c0_i32_1 : i32, i32, i32
  }
  func.func @transform_6(%arg0: i32, %arg1: memref<2xi32, #tpu.memory_space<smem>>) -> (i32, i32, i32) {
    %c0_i32 = arith.constant 0 : i32
    %c0_i32_0 = arith.constant 0 : i32
    %c0_i32_1 = arith.constant 0 : i32
    %c0_i32_2 = arith.constant 0 : i32
    return %c0_i32, %c0_i32_0, %c0_i32_1 : i32, i32, i32
  }
  func.func @transform_7(%arg0: i32, %arg1: memref<2xi32, #tpu.memory_space<smem>>) -> (i32, i32, i32) {
    %c0_i32 = arith.constant 0 : i32
    %c0_i32_0 = arith.constant 0 : i32
    %c0_i32_1 = arith.constant 0 : i32
    return %arg0, %c0_i32, %c0_i32_0 : i32, i32, i32
  }
}

</mosaic_0001>

<bundles_post_ra>
// kernel: tpu_custom_call.1
= control target key start
LH: loop header
LB: loop body
LE: loop exit
PB: predicated region body
PF: predicated region fallthrough
CT: control target
= control target key end

     0   :  { %s2521_s0 = inlined_call_operand.vmem [shape: s32[2], index: 0, kind: input, shape index: {}]   ;;  %s2522_s1 = inlined_call_operand.vmem [shape: f32[2,8,16], index: 1, kind: input, shape index: {}]   ;;  %s2523_s2 = inlined_call_operand.vmem [shape: f32[2,8,16], index: 2, kind: input, shape index: {}]   ;;  %s2524_s3 = inlined_call_operand.vmem [shape: f32[2,8,16], index: 3, kind: input, shape index: {}]   ;;  %s2525_s4 = inlined_call_operand.vmem [shape: bf16[4,16,8], index: 4, kind: input, shape index: {}]   ;;  %s2526_s5 = inlined_call_operand.vmem [shape: bf16[4,16,8], index: 5, kind: input, shape index: {}]   ;;  %s2527_s6 = inlined_call_operand.vmem [shape: bf16[4,16,8], index: 6, kind: input, shape index: {}]   ;;  %s2528_s7 = inlined_call_operand.vmem [shape: bf16[4,8,32], index: 7, kind: input, shape index: {}]   ;;  %s2529_s8 = inlined_call_operand.hbm [shape: f32[2,8,32], index: 8, kind: output, shape index: {}]  }
   0x1   :  { %s13_s29 = sshll.u32 %s2521_s0, 4  ;;  %s14_s29 = int_to_ptr.vmem [resolvable:$true] %s13_s29 }
   0x2   :  { %s2129_s30 = scalar_lea.vmem %s14_s29, 16  ;;  %p2134_p1 = scmp.lt.s32.totalorder %s14_s29, %s14_s29 }
   0x3   :  { %p2130_p0 = scmp.ne.s32.totalorder %s14_s29, %s2129_s30  ;;  %p2135_p2 = scmp.lt.s32.totalorder %s2129_s30, %s2129_s30 }
   0x5   :  { %p2136_p3 = por %p2135_p2, %p2134_p1 }
   0x7   :  { %p2137_p4 = pnand %p2136_p3, %p2130_p0 }
   0x9   :  { %2140 = shalt.err (!%p2137_p4)  }
   0xa   :  { %s2165_s9 = smov [#allocation3]  }
   0xb   :  { %16 = dma.vmem_to_smem %s14_s29, 16, %s2165_s9, [#allocation2] }
   0xc   :  { %2161 = dma.done.wait [#allocation2], 16 }
   0xd   :  { %2162 = vsyncadd [#allocation2], 4294967280 }
   0xe   :  { %18 = sfence }
   0xf   :  { %v2085_v0 = vld [vmem:[%s2525_s4] sm:$0xff]   ;;  %v2166_v1 = vmov 0.0   ;;  %vm2167_vm0 = vmmov 0   ;;  %v37_v4 = vld [vmem:[%s2522_s1 + $0x8] sm:$0xff]  ;;  %vm62_vm1 = vcmask 130048  }
  0x10   :  { %1887 = vmatprep.subr.bf16.mxu0 %v2166_v1  ;;  %1893 = vmatprep.subr.bf16.mxu1 %v2166_v1  ;;  %v2086_v2 = vld [vmem:[%s2526_s5] sm:$0xff]   ;;  %v40_v7 = vld [vmem:[%s2523_s2 + $0x8] sm:$0xff] }
  0x11   :  { %1888 = vmatpush3.bf16.msra.mxu0 %v2085_v0  ;;  %1889 = vmatprep.mubr.msk.bf16.mxu0 %vm2167_vm0, %v2166_v1  ;;  %v36_v3 = vld [vmem:[%s2522_s1] sm:$0xff] }
  0x12   :  { %v39_v5 = vld [vmem:[%s2523_s2] sm:$0xff]  ;;  %1894 = vmatpush3.bf16.msra.mxu1 %v2086_v2  ;;  %1895 = vmatprep.mubr.msk.bf16.mxu1 %vm2167_vm0, %v2166_v1  ;;  %v2240_v6 = vpack.c.bf16 %v37_v4, %v36_v3 }
  0x13   :  { %v2245_v8 = vpack.c.bf16 %v40_v7, %v39_v5  ;;  %1899 = vmatprep.subr.bf16.mxu0 %v2166_v1  ;;  %v2087_v9 = vld [vmem:[%s2527_s6] sm:$0xff]   ;;  %1905 = vmatprep.subr.bf16.mxu1 %v2166_v1 }
  0x14   :  { %1890 = vmatmul.mubr.msk.bf16.vlgmr.msra.gmra.mxu0 %vm62_vm1, %v2240_v6 }
  0x15   :  { %1896 = vmatmul.mubr.msk.bf16.vlgmr.msra.gmra.mxu1 %vm62_vm1, %v2245_v8  ;;  %1900 = vmatpush3.bf16.msra.mxu0 %v2087_v9 }
  0x16   :  { %1901 = vmatprep.mubr.msk.bf16.mxu0 %vm2167_vm0, %v2166_v1  ;;  %1911 = vmatprep.subr.bf16.mxu0 %v2166_v1 }
  0x17   :  { %1907 = vmatprep.mubr.msk.bf16.mxu1 %vm2167_vm0, %v2166_v1 }
  0x18   :  { %19 = vsyncpa [#allocation5], 0  ;;  %v42_v10 = vld [vmem:[%s2524_s3] sm:$0xff]  ;;  %v43_v11 = vld [vmem:[%s2524_s3 + $0x8] sm:$0xff]  ;;  %vm219_vm2 = vcmask 64512   ;;  %vm341_vm3 = vcmask 1043456   ;;  %v45_v37 = vlaneseq }
  0x19   :  { %v2267_v12 = vpack.c.bf16 %v43_v11, %v42_v10  ;;  %s1757_s3 = sld [smem:[#allocation3 + $0x1]]  ;;  %v2088_v7 = vld [vmem:[%s2526_s5 + $0x8] sm:$0xff]   ;;  %vm1738_vm6 = vcmask 261120   ;;  %s2168_s24 = smov [#allocation4]  }
  0x1a   :  { %s47_s25 = sld [smem:[#allocation3]]  ;;  %v46_v39 = vand.u32 127, %v45_v37 }
  0x1c   :  { %1902 = vmatmul.mubr.msk.bf16.vlgmr.msra.gmra.mxu0 %vm62_vm1, %v2267_v12 }
  0x1d   :  { %1913 = vmatprep.mubr.msk.bf16.mxu0 %vm2167_vm0, %v2166_v1 }
  0x1f   :  { %v51_v38 = vstv %s1757_s3 }
  0x20   :  { %v48_v41 = vstv %s47_s25  ;;  %vm2287_vm4 = vcmp.lt.s32.totalorder %v46_v39, %v51_v38 }
  0x21   :  { %vm2291_vm5 = vcmp.lt.s32.totalorder %v46_v39, %v48_v41 }
  0xd4   :  { %v100_v13 = vpop.f32.mrf.mxu0 }
  0xd5   :  { %v154_v14 = vpop.f32.mrf.mxu1  ;;  %v107_v18 = vmul.f32 0.35355338, %v100_v13  ;;  %v2089_v13 = vld [vmem:[%s2525_s4 + $0x8] sm:$0xff]  }
  0xd6   :  { %v215_v15 = vpack.c.bf16 %v154_v14, %v154_v14  ;;  %v1891_v16 = vpop.f32.mrf.mxu0 }
  0xd7   :  { %v1897_v17 = vpop.f32.mrf.mxu1  ;;  %v213_v25 = vpack.c.bf16 %v107_v18, %v107_v18 }
  0xd8   :  { %v224_v19 = vsel %vm219_vm2, %v215_v15, 0  ;;  %v103_v20 = vpop.f32.mrf.mxu0  ;;  %v2090_v15 = vld [vmem:[%s2527_s6 + $0x8] sm:$0xff]  }
  0xd9   :  { %v157_v21 = vpop.f32.mrf.mxu1  ;;  %1906 = vmatpush3.bf16.xpose.msra.mxu1 %v224_v19  ;;  %v108_v27 = vmul.f32 0.35355338, %v103_v20 }
  0xda   :  { %v216_v22 = vpack.c.bf16 %v157_v21, %v157_v21  ;;  %v1892_v23 = vpop.f32.mrf.mxu0  ;;  %1917 = vmatprep.subr.bf16.mxu1 %v2166_v1 }
  0xdb   :  { %v1898_v24 = vpop.f32.mrf.mxu1  ;;  %v214_v28 = vpack.c.bf16 %v108_v27, %v108_v27 }
  0xdc   :  { %v270_v26 = vsel %vm219_vm2, %v216_v22, 0  ;;  %v206_v29 = vpop.f32.mrf.mxu0 }
  0xdd   :  { %1912 = vmatpush3.bf16.xpose.msra.mxu0 %v270_v26  ;;  %v217_v30 = vpack.c.bf16 %v206_v29, %v206_v29 }
  0xde   :  { %1923 = vmatprep.subr.bf16.mxu0 %v2166_v1  ;;  %v1903_v31 = vpop.f32.mrf.mxu0 }
  0xdf   :  { %v343_v32 = vsel %vm341_vm3, %v217_v30, 0 }
  0xe0   :  { %1908 = vmatmul.mubr.msk.bf16.vlgmr.msra.gmra.mxu1 %vm219_vm2, %v213_v25  ;;  %v209_v33 = vpop.f32.mrf.mxu0 }
  0xe1   :  { %1919 = vmatprep.mubr.msk.bf16.mxu1 %vm2167_vm0, %v2166_v1  ;;  %1918 = vmatpush3.bf16.msra.mxu1 %v343_v32  ;;  %v218_v34 = vpack.c.bf16 %v209_v33, %v209_v33 }
  0xe2   :  { %1929 = vmatprep.subr.bf16.mxu1 %v2166_v1  ;;  %v1904_v35 = vpop.f32.mrf.mxu0 }
  0xe3   :  { %v389_v36 = vsel %vm341_vm3, %v218_v34, 0 }
  0xe4   :  { %1914 = vmatmul.mubr.msk.bf16.vlgmr.msra.gmra.mxu0 %vm219_vm2, %v214_v28 }
  0xe5   :  { %1925 = vmatprep.mubr.msk.bf16.mxu0 %vm2167_vm0, %v2166_v1  ;;  %1924 = vmatpush3.bf16.msra.mxu0 %v389_v36 }
  0xe6   :  { %1935 = vmatprep.subr.bf16.mxu0 %v2166_v1 }
 0x1a0   :  { %v260_v40 = vpop.f32.mrf.mxu1 }
 0x1a1   :  { %v312_v51 = vsel %vm2291_vm5, %v260_v40, -1000000.0 }
 0x1a2   :  { %v1909_v42 = vpop.f32.mrf.mxu1  ;;  %v314_v54 = vsel %vm219_vm2, %v312_v51, -inf }
 0x1a4   :  { %v263_v45 = vpop.f32.mrf.mxu1  ;;  %v306_v46 = vpop.f32.mrf.mxu0 }
 0x1a5   :  { %v313_v47 = vsel %vm2287_vm4, %v306_v46, -1000000.0 }
 0x1a6   :  { %v1910_v48 = vpop.f32.mrf.mxu1  ;;  %v1915_v49 = vpop.f32.mrf.mxu0  ;;  %v317_v50 = vsel %vm219_vm2, %v313_v47, -inf }
 0x1a7   :  { %318 = vmax.xlane.f32.xlu0 %v317_v50 }
 0x1a8   :  { %v309_v52 = vpop.f32.mrf.mxu0 }
 0x1aa   :  { %v1916_v53 = vpop.f32.mrf.mxu0 }
 0x1ab   :  { %315 = vmax.xlane.f32.xlu0 %v314_v54 }
 0x230   :  { %v319_v55 = vpop.xlane.xlu0 %318 }
 0x231   :  { %v321_v56 = vsub.f32 %v313_v47, %v319_v55 }
 0x233   :  { %v324_v57 = vmul.f32 1.442695, %v321_v56 }
 0x234   :  { %v316_v58 = vpop.xlane.xlu0 %315 }
 0x235   :  { %2097 = vpow2.f32 %v324_v57  ;;  %v320_v59 = vsub.f32 %v312_v51, %v316_v58 }
 0x237   :  { %v322_v60 = vmul.f32 1.442695, %v320_v59 }
 0x239   :  { %2099 = vpow2.f32 %v322_v60 }
 0x242   :  { %v2098_v61 = vpop.eup %2097 }
 0x243   :  { %v329_v62 = vsel %vm219_vm2, %v2098_v61, 0.0 }
 0x244   :  { %330 = vadd.xlane.f32.xlu1 %v329_v62 }
 0x246   :  { %v2100_v63 = vpop.eup %2099 }
 0x247   :  { %v326_v0 = vsel %vm219_vm2, %v2100_v63, 0.0 }
 0x248   :  { %327 = vadd.xlane.f32.xlu1 %v326_v0 }
 0x2cd   :  { %v331_v2 = vpop.xlane.xlu1 %330 }
 0x2ce   :  { %2101 = vrcp.f32 %v331_v2 }
 0x2d1   :  { %v328_v3 = vpop.xlane.xlu1 %327 }
 0x2d2   :  { %2103 = vrcp.f32 %v328_v3 }
 0x2db   :  { %v2102_v4 = vpop.eup %2101 }
 0x2dc   :  { %v335_v5 = vmul.f32 %v2102_v4, %v2098_v61 }
 0x2de   :  { %v337_v9 = vpack.c.bf16 %v335_v5, %v335_v5 }
 0x2df   :  { %v2104_v10 = vpop.eup %2103 }
 0x2e0   :  { %1926 = vmatmul.mubr.msk.bf16.vlgmr.msra.gmra.mxu0 %vm219_vm2, %v337_v9  ;;  %v334_v11 = vmul.f32 %v2104_v10, %v2100_v63 }
 0x2e1   :  { %1936 = vmatpush3.bf16.msra.mxu0 %v2088_v7  ;;  %1937 = vmatprep.mubr.msk.bf16.mxu0 %vm2167_vm0, %v2166_v1 }
 0x2e2   :  { %v336_v14 = vpack.c.bf16 %v334_v11, %v334_v11  ;;  %1947 = vmatprep.subr.bf16.mxu0 %v2166_v1 }
 0x2e4   :  { %1920 = vmatmul.mubr.msk.bf16.vlgmr.msra.gmra.mxu1 %vm219_vm2, %v336_v14 }
 0x2e5   :  { %1930 = vmatpush3.bf16.msra.mxu1 %v2089_v13  ;;  %1931 = vmatprep.mubr.msk.bf16.mxu1 %vm2167_vm0, %v2166_v1 }
 0x2e6   :  { %1941 = vmatprep.subr.bf16.mxu1 %v2166_v1 }
 0x2e8   :  { %1938 = vmatmul.mubr.msk.bf16.vlgmr.msra.gmra.mxu0 %vm62_vm1, %v2245_v8 }
 0x2e9   :  { %1949 = vmatprep.mubr.msk.bf16.mxu0 %vm2167_vm0, %v2166_v1 }
 0x2ec   :  { %1932 = vmatmul.mubr.msk.bf16.vlgmr.msra.gmra.mxu1 %vm62_vm1, %v2240_v6 }
 0x2ed   :  { %1943 = vmatprep.mubr.msk.bf16.mxu1 %vm2167_vm0, %v2166_v1  ;;  %1942 = vmatpush3.bf16.msra.mxu1 %v2090_v15 }
 0x2ee   :  { %1953 = vmatprep.subr.bf16.mxu1 %v2166_v1 }
 0x2f4   :  { %1944 = vmatmul.mubr.msk.bf16.vlgmr.msra.gmra.mxu1 %vm62_vm1, %v2267_v12 }
 0x2f5   :  { %1955 = vmatprep.mubr.msk.bf16.mxu1 %vm2167_vm0, %v2166_v1 }
 0x3a0   :  { %v2333_v16 = vpop.f32.mrf.mxu0 }
 0x3a2   :  { %v1927_v17 = vpop.f32.mrf.mxu0 }
 0x3a4   :  { %v2335_v18 = vpop.f32.mrf.mxu1  ;;  %v428_v19 = vpop.f32.mrf.mxu0 }
 0x3a5   :  { %v431_v20 = vpack.c.bf16 %v2333_v16, %v2335_v18 }
 0x3a6   :  { %v1921_v21 = vpop.f32.mrf.mxu1  ;;  %v1928_v22 = vpop.f32.mrf.mxu0 }
 0x3a7   :  { %v432_v22 = vld [vmem:[%s2528_s7] sm:$0xf] }
 0x3a8   :  { %v382_v23 = vpop.f32.mrf.mxu1  ;;  %v528_v24 = vpop.f32.mrf.mxu0 }
 0x3a9   :  { %v587_v25 = vpack.c.bf16 %v528_v24, %v528_v24 }
 0x3aa   :  { %v1922_v26 = vpop.f32.mrf.mxu1  ;;  %v1939_v27 = vpop.f32.mrf.mxu0 }
 0x3ab   :  { %v595_v28 = vsel %vm219_vm2, %v587_v25, 0  ;;  %v855_v25 = vsel %vm341_vm3, %v432_v22, 0  ;;  %v2091_v26 = vld [vmem:[%s2526_s5 + $0x10] sm:$0xff]   ;;  %v1784_v27 = vld [vmem:[%s2528_s7 + $0x4] sm:$0xf] }
 0x3ac   :  { %v476_v29 = vpop.f32.mrf.mxu1  ;;  %v531_v30 = vpop.f32.mrf.mxu0  ;;  %1948 = vmatpush3.bf16.xpose.msra.mxu0 %v595_v28  ;;  %v808_v28 = vsel %vm341_vm3, %v1784_v27, 0 }
 0x3ad   :  { %v483_v31 = vmul.f32 0.35355338, %v476_v29  ;;  %v588_v32 = vpack.c.bf16 %v531_v30, %v531_v30  ;;  %1959 = vmatprep.subr.bf16.mxu0 %v2166_v1  ;;  %v2092_v30 = vld [vmem:[%s2525_s4 + $0x10] sm:$0xff]  }
 0x3ae   :  { %v1933_v33 = vpop.f32.mrf.mxu1  ;;  %v1940_v34 = vpop.f32.mrf.mxu0 }
 0x3af   :  { %v585_v35 = vpack.c.bf16 %v483_v31, %v483_v31  ;;  %v641_v36 = vsel %vm219_vm2, %v588_v32, 0 }
 0x3b0   :  { %v479_v37 = vpop.f32.mrf.mxu1  ;;  %1954 = vmatpush3.bf16.xpose.msra.mxu1 %v641_v36 }
 0x3b1   :  { %v484_v38 = vmul.f32 0.35355338, %v479_v37  ;;  %1965 = vmatprep.subr.bf16.mxu1 %v2166_v1 }
 0x3b2   :  { %v1934_v39 = vpop.f32.mrf.mxu1 }
 0x3b3   :  { %1950 = vmatmul.mubr.msk.bf16.vlgmr.msra.gmra.mxu0 %vm219_vm2, %v585_v35  ;;  %v586_v40 = vpack.c.bf16 %v484_v38, %v484_v38 }
 0x3b4   :  { %1961 = vmatprep.mubr.msk.bf16.mxu0 %vm2167_vm0, %v2166_v1  ;;  %v578_v41 = vpop.f32.mrf.mxu1 }
 0x3b5   :  { %v589_v42 = vpack.c.bf16 %v578_v41, %v578_v41 }
 0x3b6   :  { %v1945_v45 = vpop.f32.mrf.mxu1 }
 0x3b7   :  { %1956 = vmatmul.mubr.msk.bf16.vlgmr.msra.gmra.mxu1 %vm219_vm2, %v586_v40  ;;  %v713_v46 = vsel %vm341_vm3, %v589_v42, 0  ;;  %v2093_v45 = vld [vmem:[%s2527_s6 + $0x10] sm:$0xff]  }
 0x3b8   :  { %1967 = vmatprep.mubr.msk.bf16.mxu1 %vm2167_vm0, %v2166_v1  ;;  %v581_v47 = vpop.f32.mrf.mxu1  ;;  %1960 = vmatpush3.bf16.msra.mxu0 %v713_v46 }
 0x3b9   :  { %v590_v48 = vpack.c.bf16 %v581_v47, %v581_v47  ;;  %1971 = vmatprep.subr.bf16.mxu0 %v2166_v1 }
 0x3ba   :  { %v1946_v49 = vpop.f32.mrf.mxu1 }
 0x3bb   :  { %v759_v50 = vsel %vm341_vm3, %v590_v48, 0 }
 0x3bc   :  { %1966 = vmatpush3.bf16.msra.mxu1 %v759_v50 }
 0x3bd   :  { %1977 = vmatprep.subr.bf16.mxu1 %v2166_v1 }
 0x473   :  { %v631_v51 = vpop.f32.mrf.mxu0 }
 0x474   :  { %v683_v52 = vsel %vm2291_vm5, %v631_v51, -1000000.0 }
 0x475   :  { %v1951_v53 = vpop.f32.mrf.mxu0  ;;  %v685_v54 = vsel %vm219_vm2, %v683_v52, -inf }
 0x476   :  { %686 = vmax.xlane.f32.xlu0 %v685_v54 }
 0x477   :  { %v634_v55 = vpop.f32.mrf.mxu0  ;;  %v677_v56 = vpop.f32.mrf.mxu1 }
 0x478   :  { %v684_v57 = vsel %vm2287_vm4, %v677_v56, -1000000.0 }
 0x479   :  { %v1952_v58 = vpop.f32.mrf.mxu0  ;;  %v1957_v59 = vpop.f32.mrf.mxu1  ;;  %v688_v60 = vsel %vm219_vm2, %v684_v57, -inf }
 0x47a   :  { %689 = vmax.xlane.f32.xlu1 %v688_v60 }
 0x47b   :  { %v680_v61 = vpop.f32.mrf.mxu1 }
 0x47d   :  { %v1958_v62 = vpop.f32.mrf.mxu1 }
 0x4ff   :  { %v687_v63 = vpop.xlane.xlu0 %686 }
 0x500   :  { %v691_v0 = vsub.f32 %v683_v52, %v687_v63 }
 0x502   :  { %v693_v2 = vmul.f32 1.442695, %v691_v0 }
 0x503   :  { %v690_v3 = vpop.xlane.xlu1 %689 }
 0x504   :  { %2105 = vpow2.f32 %v693_v2  ;;  %v692_v4 = vsub.f32 %v684_v57, %v690_v3 }
 0x506   :  { %v695_v5 = vmul.f32 1.442695, %v692_v4 }
 0x508   :  { %2107 = vpow2.f32 %v695_v5 }
 0x511   :  { %v2106_v7 = vpop.eup %2105 }
 0x512   :  { %v697_v9 = vsel %vm219_vm2, %v2106_v7, 0.0 }
 0x513   :  { %698 = vadd.xlane.f32.xlu0 %v697_v9 }
 0x515   :  { %v2108_v10 = vpop.eup %2107 }
 0x516   :  { %v700_v11 = vsel %vm219_vm2, %v2108_v10, 0.0 }
 0x517   :  { %701 = vadd.xlane.f32.xlu1 %v700_v11 }
 0x59c   :  { %v699_v13 = vpop.xlane.xlu0 %698 }
 0x59d   :  { %2109 = vrcp.f32 %v699_v13 }
 0x5a0   :  { %v702_v14 = vpop.xlane.xlu1 %701 }
 0x5a1   :  { %2111 = vrcp.f32 %v702_v14 }
 0x5aa   :  { %v2110_v15 = vpop.eup %2109 }
 0x5ab   :  { %v705_v17 = vmul.f32 %v2110_v15, %v2106_v7 }
 0x5ad   :  { %v707_v19 = vpack.c.bf16 %v705_v17, %v705_v17 }
 0x5ae   :  { %v2112_v21 = vpop.eup %2111 }
 0x5af   :  { %1962 = vmatmul.mubr.msk.bf16.vlgmr.msra.gmra.mxu0 %vm219_vm2, %v707_v19  ;;  %v706_v23 = vmul.f32 %v2112_v21, %v2108_v10 }
 0x5b0   :  { %1973 = vmatprep.mubr.msk.bf16.mxu0 %vm2167_vm0, %v2166_v1  ;;  %1972 = vmatpush3.bf16.msra.mxu0 %v808_v28 }
 0x5b1   :  { %v708_v24 = vpack.c.bf16 %v706_v23, %v706_v23  ;;  %1983 = vmatprep.subr.bf16.mxu0 %v2166_v1 }
 0x5b3   :  { %1968 = vmatmul.mubr.msk.bf16.vlgmr.msra.gmra.mxu1 %vm219_vm2, %v708_v24 }
 0x5b4   :  { %1978 = vmatpush3.bf16.msra.mxu1 %v855_v25  ;;  %1979 = vmatprep.mubr.msk.bf16.mxu1 %vm2167_vm0, %v2166_v1 }
 0x5b5   :  { %1989 = vmatprep.subr.bf16.mxu1 %v2166_v1 }
 0x5bb   :  { %1980 = vmatmul.mubr.msk.bf16.vlgmr.msra.gmra.mxu1 %vm219_vm2, %v431_v20 }
 0x5bc   :  { %1991 = vmatprep.mubr.msk.bf16.mxu1 %vm2167_vm0, %v2166_v1  ;;  %1990 = vmatpush3.bf16.msra.mxu1 %v2091_v26 }
 0x5bd   :  { %2001 = vmatprep.subr.bf16.mxu1 %v2166_v1 }
 0x5c3   :  { %1992 = vmatmul.mubr.msk.bf16.vlgmr.msra.gmra.mxu1 %vm62_vm1, %v2245_v8 }
 0x5c4   :  { %2003 = vmatprep.mubr.msk.bf16.mxu1 %vm2167_vm0, %v2166_v1 }
 0x66f   :  { %v749_v16 = vpop.f32.mrf.mxu0 }
 0x671   :  { %v1963_v18 = vpop.f32.mrf.mxu0 }
 0x673   :  { %v752_v20 = vpop.f32.mrf.mxu0  ;;  %v795_v29 = vpop.f32.mrf.mxu1 }
 0x674   :  { %v801_v31 = vpack.c.bf16 %v795_v29, %v749_v16 }
 0x675   :  { %v1964_v32 = vpop.f32.mrf.mxu0  ;;  %v1969_v33 = vpop.f32.mrf.mxu1 }
 0x676   :  { %1974 = vmatmul.mubr.msk.bf16.vlgmr.msra.gmra.mxu0 %vm219_vm2, %v801_v31 }
 0x677   :  { %v798_v34 = vpop.f32.mrf.mxu1  ;;  %1984 = vmatpush3.bf16.msra.mxu0 %v2092_v30  ;;  %1985 = vmatprep.mubr.msk.bf16.mxu0 %vm2167_vm0, %v2166_v1 }
 0x678   :  { %1995 = vmatprep.subr.bf16.mxu0 %v2166_v1 }
 0x679   :  { %v1970_v35 = vpop.f32.mrf.mxu1 }
 0x67b   :  { %v2398_v36 = vpop.f32.mrf.mxu1 }
 0x67d   :  { %v1981_v37 = vpop.f32.mrf.mxu1 }
 0x67e   :  { %1986 = vmatmul.mubr.msk.bf16.vlgmr.msra.gmra.mxu0 %vm62_vm1, %v2240_v6 }
 0x67f   :  { %v2402_v38 = vpop.f32.mrf.mxu1  ;;  %1997 = vmatprep.mubr.msk.bf16.mxu0 %vm2167_vm0, %v2166_v1  ;;  %1996 = vmatpush3.bf16.msra.mxu0 %v2093_v45  ;;  %v1803_v45 = vld [vmem:[%s2528_s7 + $0x8] sm:$0xf] }
 0x680   :  { %2007 = vmatprep.subr.bf16.mxu0 %v2166_v1 }
 0x681   :  { %v1982_v39 = vpop.f32.mrf.mxu1 }
 0x683   :  { %v993_v40 = vpop.f32.mrf.mxu1 }
 0x684   :  { %v1052_v41 = vpack.c.bf16 %v993_v40, %v993_v40 }
 0x685   :  { %v1993_v42 = vpop.f32.mrf.mxu1 }
 0x686   :  { %v1060_v46 = vsel %vm219_vm2, %v1052_v41, 0  ;;  %1998 = vmatmul.mubr.msk.bf16.vlgmr.msra.gmra.mxu0 %vm62_vm1, %v2267_v12 }
 0x687   :  { %v996_v47 = vpop.f32.mrf.mxu1  ;;  %2002 = vmatpush3.bf16.xpose.msra.mxu1 %v1060_v46  ;;  %2009 = vmatprep.mubr.msk.bf16.mxu0 %vm2167_vm0, %v2166_v1  ;;  %v1273_v46 = vsel %vm341_vm3, %v1803_v45, 0 }
 0x688   :  { %v1053_v48 = vpack.c.bf16 %v996_v47, %v996_v47  ;;  %2013 = vmatprep.subr.bf16.mxu1 %v2166_v1  ;;  %v2095_v47 = vld [vmem:[%s2525_s4 + $0x18] sm:$0xff]  }
 0x689   :  { %v1994_v49 = vpop.f32.mrf.mxu1 }
 0x68a   :  { %v1106_v50 = vsel %vm219_vm2, %v1053_v48, 0 }
 0x68b   :  { %2008 = vmatpush3.bf16.xpose.msra.mxu0 %v1106_v50 }
 0x68c   :  { %2019 = vmatprep.subr.bf16.mxu0 %v2166_v1 }
 0x736   :  { %v2418_v51 = vpop.f32.mrf.mxu0 }
 0x738   :  { %v1975_v52 = vpop.f32.mrf.mxu0 }
 0x73a   :  { %v2420_v53 = vpop.f32.mrf.mxu0 }
 0x73c   :  { %v1976_v54 = vpop.f32.mrf.mxu0 }
 0x73d   :  { %v2094_v54 = vld [vmem:[%s2526_s5 + $0x18] sm:$0xff]  }
 0x73e   :  { %v941_v55 = vpop.f32.mrf.mxu0 }
 0x73f   :  { %v948_v56 = vmul.f32 0.35355338, %v941_v55 }
 0x740   :  { %v1987_v57 = vpop.f32.mrf.mxu0 }
 0x741   :  { %v1050_v58 = vpack.c.bf16 %v948_v56, %v948_v56 }
 0x742   :  { %v944_v59 = vpop.f32.mrf.mxu0 }
 0x743   :  { %v949_v60 = vmul.f32 0.35355338, %v944_v59  ;;  %2004 = vmatmul.mubr.msk.bf16.vlgmr.msra.gmra.mxu1 %vm219_vm2, %v1050_v58  ;;  %v2096_v59 = vld [vmem:[%s2527_s6 + $0x18] sm:$0xff]  }
 0x744   :  { %v1988_v61 = vpop.f32.mrf.mxu0  ;;  %2015 = vmatprep.mubr.msk.bf16.mxu1 %vm2167_vm0, %v2166_v1 }
 0x745   :  { %v1051_v62 = vpack.c.bf16 %v949_v60, %v949_v60 }
 0x746   :  { %v1043_v63 = vpop.f32.mrf.mxu0 }
 0x747   :  { %2010 = vmatmul.mubr.msk.bf16.vlgmr.msra.gmra.mxu0 %vm219_vm2, %v1051_v62  ;;  %v1054_v0 = vpack.c.bf16 %v1043_v63, %v1043_v63  ;;  %v892_v63 = vadd.f32 %v2398_v36, %v2418_v51 }
 0x748   :  { %2021 = vmatprep.mubr.msk.bf16.mxu0 %vm2167_vm0, %v2166_v1  ;;  %v1999_v2 = vpop.f32.mrf.mxu0 }
 0x749   :  { %v1178_v3 = vsel %vm341_vm3, %v1054_v0, 0 }
 0x74a   :  { %v1046_v4 = vpop.f32.mrf.mxu0  ;;  %2014 = vmatpush3.bf16.msra.mxu1 %v1178_v3 }
 0x74b   :  { %v1055_v5 = vpack.c.bf16 %v1046_v4, %v1046_v4  ;;  %2025 = vmatprep.subr.bf16.mxu1 %v2166_v1  ;;  %v895_v4 = vadd.f32 %v2402_v38, %v2420_v53 }
 0x74c   :  { %v2000_v7 = vpop.f32.mrf.mxu0 }
 0x74d   :  { %v1224_v9 = vsel %vm341_vm3, %v1055_v5, 0 }
 0x74e   :  { %2020 = vmatpush3.bf16.msra.mxu0 %v1224_v9 }
 0x74f   :  { %2031 = vmatprep.subr.bf16.mxu0 %v2166_v1 }
 0x803   :  { %v1096_v10 = vpop.f32.mrf.mxu1 }
 0x804   :  { %v1148_v11 = vsel %vm2291_vm5, %v1096_v10, -1000000.0 }
 0x805   :  { %v2005_v13 = vpop.f32.mrf.mxu1  ;;  %v1150_v14 = vsel %vm219_vm2, %v1148_v11, -inf }
 0x806   :  { %1151 = vmax.xlane.f32.xlu0 %v1150_v14 }
 0x807   :  { %v1099_v15 = vpop.f32.mrf.mxu1  ;;  %v1142_v17 = vpop.f32.mrf.mxu0 }
 0x808   :  { %v1149_v19 = vsel %vm2287_vm4, %v1142_v17, -1000000.0 }
 0x809   :  { %v2006_v21 = vpop.f32.mrf.mxu1  ;;  %v2011_v22 = vpop.f32.mrf.mxu0  ;;  %v1153_v23 = vsel %vm219_vm2, %v1149_v19, -inf }
 0x80a   :  { %1154 = vmax.xlane.f32.xlu1 %v1153_v23 }
 0x80b   :  { %v1145_v24 = vpop.f32.mrf.mxu0 }
 0x80d   :  { %v2012_v25 = vpop.f32.mrf.mxu0 }
 0x88f   :  { %v1152_v26 = vpop.xlane.xlu0 %1151 }
 0x890   :  { %v1156_v27 = vsub.f32 %v1148_v11, %v1152_v26 }
 0x892   :  { %v1158_v28 = vmul.f32 1.442695, %v1156_v27 }
 0x893   :  { %v1155_v16 = vpop.xlane.xlu1 %1154 }
 0x894   :  { %2113 = vpow2.f32 %v1158_v28  ;;  %v1157_v18 = vsub.f32 %v1149_v19, %v1155_v16 }
 0x896   :  { %v1160_v20 = vmul.f32 1.442695, %v1157_v18 }
 0x898   :  { %2115 = vpow2.f32 %v1160_v20 }
 0x8a1   :  { %v2114_v29 = vpop.eup %2113 }
 0x8a2   :  { %v1162_v30 = vsel %vm219_vm2, %v2114_v29, 0.0 }
 0x8a3   :  { %1163 = vadd.xlane.f32.xlu0 %v1162_v30 }
 0x8a5   :  { %v2116_v31 = vpop.eup %2115 }
 0x8a6   :  { %v1165_v32 = vsel %vm219_vm2, %v2116_v31, 0.0 }
 0x8a7   :  { %1166 = vadd.xlane.f32.xlu1 %v1165_v32 }
 0x92c   :  { %v1164_v33 = vpop.xlane.xlu0 %1163 }
 0x92d   :  { %2117 = vrcp.f32 %v1164_v33 }
 0x930   :  { %v1167_v34 = vpop.xlane.xlu1 %1166 }
 0x931   :  { %2119 = vrcp.f32 %v1167_v34 }
 0x93a   :  { %v2118_v35 = vpop.eup %2117 }
 0x93b   :  { %v1170_v37 = vmul.f32 %v2118_v35, %v2114_v29 }
 0x93d   :  { %v1172_v39 = vpack.c.bf16 %v1170_v37, %v1170_v37 }
 0x93e   :  { %v2120_v40 = vpop.eup %2119 }
 0x93f   :  { %2016 = vmatmul.mubr.msk.bf16.vlgmr.msra.gmra.mxu1 %vm219_vm2, %v1172_v39  ;;  %v1171_v41 = vmul.f32 %v2120_v40, %v2116_v31 }
 0x940   :  { %2027 = vmatprep.mubr.msk.bf16.mxu1 %vm2167_vm0, %v2166_v1  ;;  %2026 = vmatpush3.bf16.msra.mxu1 %v1273_v46 }
 0x941   :  { %v1173_v42 = vpack.c.bf16 %v1171_v41, %v1171_v41  ;;  %2037 = vmatprep.subr.bf16.mxu1 %v2166_v1 }
 0x943   :  { %2022 = vmatmul.mubr.msk.bf16.vlgmr.msra.gmra.mxu0 %vm219_vm2, %v1173_v42 }
 0x944   :  { %2033 = vmatprep.mubr.msk.bf16.mxu0 %vm2167_vm0, %v2166_v1  ;;  %2032 = vmatpush3.bf16.msra.mxu0 %v2095_v47 }
 0x945   :  { %2043 = vmatprep.subr.bf16.mxu0 %v2166_v1 }
 0x94b   :  { %2034 = vmatmul.mubr.msk.bf16.vlgmr.msra.gmra.mxu0 %vm62_vm1, %v2240_v6 }
 0x94c   :  { %2045 = vmatprep.mubr.msk.bf16.mxu0 %vm2167_vm0, %v2166_v1  ;;  %2044 = vmatpush3.bf16.msra.mxu0 %v2096_v59  ;;  %v1821_v59 = vld [vmem:[%s2528_s7 + $0xc] sm:$0xf]  ;;  %s1746_s7 = sshll.u32 %s2168_s24, 4  ;;  %s1747_s7 = int_to_ptr.vmem [resolvable:$true] %s1746_s7 }
 0x94d   :  { %2055 = vmatprep.subr.bf16.mxu0 %v2166_v1  ;;  %s2141_s3 = scalar_lea.vmem %s1747_s7, 256  ;;  %p2146_p6 = scmp.lt.s32.totalorder %s1747_s7, %s1747_s7 }
 0x94e   :  { %p2142_p5 = scmp.ne.s32.totalorder %s1747_s7, %s2141_s3  ;;  %p2147_p7 = scmp.lt.s32.totalorder %s2141_s3, %s2141_s3 }
 0x950   :  { %p2148_p8 = por %p2147_p7, %p2146_p6 }
 0x952   :  { %p2149_p9 = pnand %p2148_p8, %p2142_p5 }
 0x953   :  { %2046 = vmatmul.mubr.msk.bf16.vlgmr.msra.gmra.mxu0 %vm62_vm1, %v2267_v12 }
 0x954   :  { %2057 = vmatprep.mubr.msk.bf16.mxu0 %vm2167_vm0, %v2166_v1 }
 0x9ff   :  { %v1214_v48 = vpop.f32.mrf.mxu1 }
 0xa01   :  { %v2017_v49 = vpop.f32.mrf.mxu1 }
 0xa03   :  { %v1217_v50 = vpop.f32.mrf.mxu1  ;;  %v1260_v52 = vpop.f32.mrf.mxu0 }
 0xa04   :  { %v1266_v55 = vpack.c.bf16 %v1260_v52, %v1214_v48 }
 0xa05   :  { %v2018_v56 = vpop.f32.mrf.mxu1  ;;  %v2023_v57 = vpop.f32.mrf.mxu0 }
 0xa06   :  { %2028 = vmatmul.mubr.msk.bf16.vlgmr.msra.gmra.mxu1 %vm219_vm2, %v1266_v55 }
 0xa07   :  { %v1263_v58 = vpop.f32.mrf.mxu0  ;;  %2038 = vmatpush3.bf16.msra.mxu1 %v2094_v54  ;;  %2039 = vmatprep.mubr.msk.bf16.mxu1 %vm2167_vm0, %v2166_v1 }
 0xa08   :  { %2049 = vmatprep.subr.bf16.mxu1 %v2166_v1 }
 0xa09   :  { %v2024_v6 = vpop.f32.mrf.mxu0 }
 0xa0b   :  { %v1361_v60 = vpop.f32.mrf.mxu0 }
 0xa0c   :  { %v1368_v14 = vmul.f32 0.35355338, %v1361_v60  ;;  %v1693_v60 = vsel %vm341_vm3, %v1821_v59, 0 }
 0xa0d   :  { %v2035_v61 = vpop.f32.mrf.mxu0 }
 0xa0e   :  { %2040 = vmatmul.mubr.msk.bf16.vlgmr.msra.gmra.mxu1 %vm62_vm1, %v2245_v8  ;;  %v1470_v17 = vpack.c.bf16 %v1368_v14, %v1368_v14 }
 0xa0f   :  { %2051 = vmatprep.mubr.msk.bf16.mxu1 %vm2167_vm0, %v2166_v1  ;;  %v1364_v62 = vpop.f32.mrf.mxu0 }
 0xa10   :  { %v1369_v38 = vmul.f32 0.35355338, %v1364_v62 }
 0xa11   :  { %v2036_v8 = vpop.f32.mrf.mxu0 }
 0xa12   :  { %v1471_v53 = vpack.c.bf16 %v1369_v38, %v1369_v38 }
 0xa13   :  { %v1463_v21 = vpop.f32.mrf.mxu0 }
 0xa14   :  { %v1474_v22 = vpack.c.bf16 %v1463_v21, %v1463_v21 }
 0xa15   :  { %v2047_v23 = vpop.f32.mrf.mxu0 }
 0xa16   :  { %v1598_v24 = vsel %vm341_vm3, %v1474_v22, 0 }
 0xa17   :  { %v1466_v25 = vpop.f32.mrf.mxu0 }
 0xa18   :  { %v1475_v26 = vpack.c.bf16 %v1466_v25, %v1466_v25 }
 0xa19   :  { %v2048_v27 = vpop.f32.mrf.mxu0 }
 0xa1a   :  { %v1644_v28 = vsel %vm341_vm3, %v1475_v26, 0 }
 0xac6   :  { %v1309_v0 = vpop.f32.mrf.mxu1 }
 0xac7   :  { %v2480_v2 = vadd.f32 %v1309_v0, %v892_v63 }
 0xac8   :  { %v2029_v3 = vpop.f32.mrf.mxu1 }
 0xaca   :  { %v1312_v5 = vpop.f32.mrf.mxu1 }
 0xacb   :  { %v2484_v7 = vadd.f32 %v1312_v5, %v895_v4 }
 0xacc   :  { %v2030_v12 = vpop.f32.mrf.mxu1 }
 0xace   :  { %v1413_v9 = vpop.f32.mrf.mxu1 }
 0xacf   :  { %v1472_v10 = vpack.c.bf16 %v1413_v9, %v1413_v9 }
 0xad0   :  { %v2041_v11 = vpop.f32.mrf.mxu1 }
 0xad1   :  { %v1480_v13 = vsel %vm219_vm2, %v1472_v10, 0 }
 0xad2   :  { %v1416_v15 = vpop.f32.mrf.mxu1  ;;  %2050 = vmatpush3.bf16.xpose.msra.mxu1 %v1480_v13 }
 0xad3   :  { %v1473_v36 = vpack.c.bf16 %v1416_v15, %v1416_v15  ;;  %2061 = vmatprep.subr.bf16.mxu1 %v2166_v1 }
 0xad4   :  { %v2042_v51 = vpop.f32.mrf.mxu1 }
 0xad5   :  { %v1526_v19 = vsel %vm219_vm2, %v1473_v36, 0 }
 0xad6   :  { %2056 = vmatpush3.bf16.xpose.msra.mxu0 %v1526_v19 }
 0xad7   :  { %2067 = vmatprep.subr.bf16.mxu0 %v2166_v1 }
 0xad9   :  { %2052 = vmatmul.mubr.msk.bf16.vlgmr.msra.gmra.mxu1 %vm219_vm2, %v1470_v17 }
 0xada   :  { %2063 = vmatprep.mubr.msk.bf16.mxu1 %vm2167_vm0, %v2166_v1  ;;  %2062 = vmatpush3.bf16.msra.mxu1 %v1598_v24 }
 0xadb   :  { %2073 = vmatprep.subr.bf16.mxu1 %v2166_v1 }
 0xadd   :  { %2058 = vmatmul.mubr.msk.bf16.vlgmr.msra.gmra.mxu0 %vm219_vm2, %v1471_v53 }
 0xade   :  { %2069 = vmatprep.mubr.msk.bf16.mxu0 %vm2167_vm0, %v2166_v1  ;;  %2068 = vmatpush3.bf16.msra.mxu0 %v1644_v28 }
 0xb99   :  { %v1516_v16 = vpop.f32.mrf.mxu1 }
 0xb9a   :  { %v1568_v18 = vsel %vm2291_vm5, %v1516_v16, -1000000.0 }
 0xb9b   :  { %v2053_v20 = vpop.f32.mrf.mxu1  ;;  %v1570_v29 = vsel %vm219_vm2, %v1568_v18, -inf }
 0xb9c   :  { %1571 = vmax.xlane.f32.xlu0 %v1570_v29 }
 0xb9d   :  { %v1519_v30 = vpop.f32.mrf.mxu1  ;;  %v1562_v31 = vpop.f32.mrf.mxu0 }
 0xb9e   :  { %v1569_v32 = vsel %vm2287_vm4, %v1562_v31, -1000000.0 }
 0xb9f   :  { %v2054_v33 = vpop.f32.mrf.mxu1  ;;  %v2059_v34 = vpop.f32.mrf.mxu0  ;;  %v1573_v35 = vsel %vm219_vm2, %v1569_v32, -inf }
 0xba0   :  { %1574 = vmax.xlane.f32.xlu1 %v1573_v35 }
 0xba1   :  { %v1565_v37 = vpop.f32.mrf.mxu0 }
 0xba3   :  { %v2060_v39 = vpop.f32.mrf.mxu0 }
 0xc25   :  { %v1572_v40 = vpop.xlane.xlu0 %1571 }
 0xc26   :  { %v1576_v41 = vsub.f32 %v1568_v18, %v1572_v40 }
 0xc28   :  { %v1578_v44 = vmul.f32 1.442695, %v1576_v41 }
 0xc29   :  { %v1575_v42 = vpop.xlane.xlu1 %1574 }
 0xc2a   :  { %2121 = vpow2.f32 %v1578_v44  ;;  %v1577_v45 = vsub.f32 %v1569_v32, %v1575_v42 }
 0xc2c   :  { %v1580_v46 = vmul.f32 1.442695, %v1577_v45 }
 0xc2e   :  { %2123 = vpow2.f32 %v1580_v46 }
 0xc37   :  { %v2122_v47 = vpop.eup %2121 }
 0xc38   :  { %v1582_v48 = vsel %vm219_vm2, %v2122_v47, 0.0 }
 0xc39   :  { %1583 = vadd.xlane.f32.xlu0 %v1582_v48 }
 0xc3b   :  { %v2124_v43 = vpop.eup %2123 }
 0xc3c   :  { %v1585_v49 = vsel %vm219_vm2, %v2124_v43, 0.0 }
 0xc3d   :  { %1586 = vadd.xlane.f32.xlu1 %v1585_v49 }
 0xcc2   :  { %v1584_v50 = vpop.xlane.xlu0 %1583 }
 0xcc3   :  { %2125 = vrcp.f32 %v1584_v50 }
 0xcc6   :  { %v1587_v52 = vpop.xlane.xlu1 %1586 }
 0xcc7   :  { %2127 = vrcp.f32 %v1587_v52 }
 0xcd0   :  { %v2126_v54 = vpop.eup %2125 }
 0xcd1   :  { %v1590_v55 = vmul.f32 %v2126_v54, %v2122_v47 }
 0xcd3   :  { %v1592_v56 = vpack.c.bf16 %v1590_v55, %v1590_v55 }
 0xcd4   :  { %v2128_v57 = vpop.eup %2127 }
 0xcd5   :  { %2064 = vmatmul.mubr.msk.bf16.vlgmr.msra.gmra.mxu1 %vm219_vm2, %v1592_v56  ;;  %v1591_v58 = vmul.f32 %v2128_v57, %v2124_v43 }
 0xcd6   :  { %2075 = vmatprep.mubr.msk.bf16.mxu1 %vm2167_vm0, %v2166_v1  ;;  %2074 = vmatpush3.bf16.msra.mxu1 %v1693_v60 }
 0xcd7   :  { %v1593_v6 = vpack.c.bf16 %v1591_v58, %v1591_v58 }
 0xcd9   :  { %2070 = vmatmul.mubr.msk.bf16.vlgmr.msra.gmra.mxu0 %vm219_vm2, %v1593_v6 }
 0xd95   :  { %v1634_v61 = vpop.f32.mrf.mxu1 }
 0xd97   :  { %v2065_v62 = vpop.f32.mrf.mxu1 }
 0xd99   :  { %v1637_v8 = vpop.f32.mrf.mxu1  ;;  %v1680_v63 = vpop.f32.mrf.mxu0 }
 0xd9a   :  { %v1686_v0 = vpack.c.bf16 %v1680_v63, %v1634_v61 }
 0xd9b   :  { %v2066_v3 = vpop.f32.mrf.mxu1  ;;  %v2071_v4 = vpop.f32.mrf.mxu0 }
 0xd9c   :  { %2076 = vmatmul.mubr.msk.bf16.vlgmr.msra.gmra.mxu1 %vm219_vm2, %v1686_v0 }
 0xd9d   :  { %v1683_v1 = vpop.f32.mrf.mxu0 }
 0xd9f   :  { %v2072_v5 = vpop.f32.mrf.mxu0 }
 0xe5c   :  { %v1729_v12 = vpop.f32.mrf.mxu1 }
 0xe5d   :  { %v1736_v9 = vadd.f32 %v1729_v12, %v2480_v2 }
 0xe5e   :  { %v2077_v10 = vpop.f32.mrf.mxu1 }
 0xe5f   :  { %1739 = vst.msk [vmem:[#allocation4] sm:$0xff] %vm1738_vm6, %v1736_v9 }
 0xe60   :  { %v1732_v11 = vpop.f32.mrf.mxu1 }
 0xe61   :  { %v1737_v13 = vadd.f32 %v1732_v11, %v2484_v7 }
 0xe62   :  { %v2078_v14 = vpop.f32.mrf.mxu1 }
 0xe63   :  { %1740 = vst.msk [vmem:[#allocation4 + $0x8] sm:$0xff] %vm1738_vm6, %v1737_v13 }
 0xe64   :  { %2152 = shalt.err (!%p2149_p9)
}
 0xe65   :  { %s2169_s25 = smov 128   ;;  %s2170_s26 = smov 8  }
 0xe66   :  { %1752 = dma.vmem_to_hbm [thread:$0]  %s1747_s7, 256, %s2529_s8, [#allocation5], %s2169_s25, %s2169_s25, %s2170_s26  }
 0xe67   :  { %2163 = dma.done.wait [#allocation5], 256  }
 0xe68   :  { %2164 = vsyncadd [#allocation5], 4294967040 }
 0xe69   :  { %1756 = vsyncpa [#allocation5], 1 }

</bundles_post_ra>
